<compile_context>
chip_gen: v7x
topology: tpu7x:2x2x1
jax: 0.10.0
libtpu: 0.0.40
codegen_flags: <defaults>
</compile_context>

<pallas_src>
import functools

import jax
import jax.numpy as jnp
import numpy as np
from jax.experimental import pallas as pl
from jax.experimental.pallas import tpu as pltpu


def _round_up(v, m):
    return ((v + m - 1) // m) * m


def _pad2d(a, rows, cols):
    r, c = a.shape
    return jnp.pad(a, ((0, rows - r), (0, cols - c)))


# ---------------------------------------------------------------------------
# Kernel
# ---------------------------------------------------------------------------
def _coupling_kernel(xa_ref, c_ref, xb_ref,
                     w1a_ref, w1c_ref, b1_ref,
                     w2_ref, b2_ref,
                     zb_ref, logdet_ref, *, half_p):
    # ---- fused layer 1: [scale_h | shift_h] = relu(x_a@W1a + c@W1c + b1) ----
    h = (jnp.dot(xa_ref[...], w1a_ref[...], preferred_element_type=jnp.float32)
         + jnp.dot(c_ref[...], w1c_ref[...], preferred_element_type=jnp.float32)
         + b1_ref[...])
    h = jnp.maximum(h, 0.0)

    # ---- fused layer 2 (block-diagonal W2): [scale_raw | shift_raw] ----
    st = (jnp.dot(h.astype(w2_ref.dtype), w2_ref[...],
                  preferred_element_type=jnp.float32)
          + b2_ref[...])
    scale = jnp.tanh(st[:, :half_p])     # padded cols of `scale` are exactly 0
    shift = st[:, half_p:]

    # ---- affine coupling (f32 epilogue; safe on v5e's non-bf16 VPU/EUP) ----
    zb_ref[...] = xb_ref[...] * jnp.exp(scale) + shift

    # log|det J| = sum(scale); padded columns contribute exactly zero.
    rowsum = jnp.sum(scale, axis=1, keepdims=True)
    logdet_ref[...] = jnp.broadcast_to(rowsum, logdet_ref.shape)


# ---------------------------------------------------------------------------
# Weight preparation: fuse + zero-pad to lane-dense shapes
# ---------------------------------------------------------------------------
def prepare_fused_params(params, dim, d_cond, compute_dtype=jnp.float32,
                         lane=128):
    ws1, bs1, ws2, bs2, wt1, bt1, wt2, bt2 = params
    half = dim // 2
    hidden = ws1.shape[1]
    half_p = _round_up(half, lane)
    hidden_p = _round_up(hidden, lane)
    d_cond_p = _round_up(d_cond, lane)

    # Layer-1 fused weight split by lhs operand (x_a rows / c rows) so the
    # kernel never needs an HBM-materialized concat([x_a, c]).
    w1a = jnp.zeros((half_p, 2 * hidden_p), jnp.float32)
    w1a = (w1a.at[:half, :hidden].set(ws1[:half])
               .at[:half, hidden_p:hidden_p + hidden].set(wt1[:half]))
    w1c = jnp.zeros((d_cond_p, 2 * hidden_p), jnp.float32)
    w1c = (w1c.at[:d_cond, :hidden].set(ws1[half:])
               .at[:d_cond, hidden_p:hidden_p + hidden].set(wt1[half:]))
    b1 = jnp.zeros((1, 2 * hidden_p), jnp.float32)
    b1 = (b1.at[:, :hidden].set(bs1)
             .at[:, hidden_p:hidden_p + hidden].set(bt1))

    # Layer-2 block-diagonal fused weight.
    w2 = jnp.zeros((2 * hidden_p, 2 * half_p), jnp.float32)
    w2 = (w2.at[:hidden, :half].set(ws2)
             .at[hidden_p:hidden_p + hidden, half_p:half_p + half].set(wt2))
    b2 = jnp.zeros((1, 2 * half_p), jnp.float32)
    b2 = (b2.at[:, :half].set(bs2)
             .at[:, half_p:half_p + half].set(bt2))

    fused = (w1a.astype(compute_dtype), w1c.astype(compute_dtype),
             b1, w2.astype(compute_dtype), b2)
    dims = (half, half_p, hidden_p, d_cond_p)
    return fused, dims


# ---------------------------------------------------------------------------
# Forward wrapper
# ---------------------------------------------------------------------------
def conditional_affine_coupling_forward(x, c, params,
                                        compute_dtype=jnp.float32):
    """x: [B, dim] f32, c: [B, d_cond] f32.  Returns (z [B, dim], logdet [B])."""
    B, dim = x.shape
    assert dim % 2 == 0, "dim must be even (coupling split)"
    d_cond = c.shape[1]

    fused, (half, half_p, hidden_p, d_cond_p) = prepare_fused_params(
        params, dim, d_cond, compute_dtype)
    w1a, w1c, b1, w2, b2 = fused

    # -------- batch tiling: (TB, F) activation tiles, weights resident --------
    TB = min(_round_up(B, 8), 256)
    B_pad = _round_up(B, TB)
    LD = 128                                    # lane-dense logdet output

    x_a = x[:, :half]
    x_b = x[:, half:]
    xa_p = _pad2d(x_a, B_pad, half_p).astype(compute_dtype)
    c_p = _pad2d(c, B_pad, d_cond_p).astype(compute_dtype)
    xb_p = _pad2d(x_b, B_pad, half_p)           # elementwise only -> keep f32

    grid = (B_pad // TB,)
    kernel = functools.partial(_coupling_kernel, half_p=half_p)

    # -------- advisory cost estimate --------
    flops = 2 * B_pad * (half_p * 2 * hidden_p
                         + d_cond_p * 2 * hidden_p
                         + 2 * hidden_p * 2 * half_p)
    transcendentals = 2 * B_pad * half_p        # tanh + exp
    bytes_accessed = (xa_p.size * xa_p.dtype.itemsize
                      + c_p.size * c_p.dtype.itemsize
                      + xb_p.size * 4
                      + w1a.size * w1a.dtype.itemsize
                      + w1c.size * w1c.dtype.itemsize
                      + w2.size * w2.dtype.itemsize
                      + (b1.size + b2.size) * 4
                      + B_pad * (half_p + LD) * 4)

    # -------- VMEM budget: resident weights + double-buffered act tiles ------
    weight_bytes = (w1a.size * w1a.dtype.itemsize
                    + w1c.size * w1c.dtype.itemsize
                    + w2.size * w2.dtype.itemsize
                    + (b1.size + b2.size) * 4)
    act_tile_bytes = TB * (half_p * xa_p.dtype.itemsize
                           + d_cond_p * c_p.dtype.itemsize
                           + half_p * 4          # x_b in
                           + half_p * 4          # z_b out
                           + LD * 4)             # logdet out
    vmem_est = 2 * weight_bytes + 2 * act_tile_bytes + (4 << 20)
    vmem_limit = int(min(64 << 20, max(32 << 20, vmem_est)))  # v7x-safe cap

    zb_p, logdet_p = pl.pallas_call(
        kernel,
        out_shape=(
            jax.ShapeDtypeStruct((B_pad, half_p), jnp.float32),
            jax.ShapeDtypeStruct((B_pad, LD), jnp.float32),
        ),
        grid=grid,
        in_specs=[
            pl.BlockSpec((TB, half_p), lambda i: (i, 0)),              # x_a
            pl.BlockSpec((TB, d_cond_p), lambda i: (i, 0)),            # c
            pl.BlockSpec((TB, half_p), lambda i: (i, 0)),              # x_b
            pl.BlockSpec((half_p, 2 * hidden_p), lambda i: (0, 0)),    # W1a (resident)
            pl.BlockSpec((d_cond_p, 2 * hidden_p), lambda i: (0, 0)),  # W1c (resident)
            pl.BlockSpec((1, 2 * hidden_p), lambda i: (0, 0)),         # b1  (resident)
            pl.BlockSpec((2 * hidden_p, 2 * half_p), lambda i: (0, 0)),# W2  (resident)
            pl.BlockSpec((1, 2 * half_p), lambda i: (0, 0)),           # b2  (resident)
        ],
        out_specs=(
            pl.BlockSpec((TB, half_p), lambda i: (i, 0)),              # z_b
            pl.BlockSpec((TB, LD), lambda i: (i, 0)),                  # logdet
        ),
        compiler_params=pltpu.CompilerParams(
            dimension_semantics=("parallel",),
            vmem_limit_bytes=vmem_limit,
        ),
        cost_estimate=pl.CostEstimate(
            flops=flops,
            transcendentals=transcendentals,
            bytes_accessed=bytes_accessed,
        ),
    )(xa_p, c_p, xb_p, w1a, w1c, b1, w2, b2)

    # x_a passthrough + final concat in the wrapper (free for XLA; keeps the
    # kernel's stores lane-dense and halves x_a's HBM traffic).
    z = jnp.concatenate([x_a, zb_p[:B, :half]], axis=1)
    logdet = logdet_p[:B, 0]
    return z, logdet


# ---------------------------------------------------------------------------
# Parameter init (PyTorch Linear layout stored transposed: (in, out))
# ---------------------------------------------------------------------------
def init_params(key, dim, hidden_dim, d_cond):
    half = dim // 2
    in_dim = half + d_cond
    ks = jax.random.split(key, 8)
    s = 0.2
    ws1 = s * jax.random.normal(ks[0], (in_dim, hidden_dim), jnp.float32)
    bs1 = s * jax.random.normal(ks[1], (1, hidden_dim), jnp.float32)
    ws2 = s * jax.random.normal(ks[2], (hidden_dim, half), jnp.float32)
    bs2 = s * jax.random.normal(ks[3], (1, half), jnp.float32)
    wt1 = s * jax.random.normal(ks[4], (in_dim, hidden_dim), jnp.float32)
    bt1 = s * jax.random.normal(ks[5], (1, hidden_dim), jnp.float32)
    wt2 = s * jax.random.normal(ks[6], (hidden_dim, half), jnp.float32)
    bt2 = s * jax.random.normal(ks[7], (1, half), jnp.float32)
    return (ws1, bs1, ws2, bs2, wt1, bt1, wt2, bt2)


def reference_forward(x, c, params):
    """Pure-JAX reference replicating the PyTorch module semantics."""
    ws1, bs1, ws2, bs2, wt1, bt1, wt2, bt2 = params
    dim = x.shape[1]
    half = dim // 2
    x_a, x_b = x[:, :half], x[:, half:]
    xac = jnp.concatenate([x_a, c], axis=1)
    scale = jnp.tanh(jnp.maximum(xac @ ws1 + bs1, 0.0) @ ws2 + bs2)
    shift = jnp.maximum(xac @ wt1 + bt1, 0.0) @ wt2 + bt2
    z_b = x_b * jnp.exp(scale) + shift
    return jnp.concatenate([x_a, z_b], axis=1), jnp.sum(scale, axis=1)


if __name__ == "__main__":
    dim, hidden_dim, d_cond = 16, 32, 8
    batch = 8

    key = jax.random.PRNGKey(0)
    k_x, k_c, k_p = jax.random.split(key, 3)
    x = jax.random.normal(k_x, (batch, dim), jnp.float32)
    c = jax.random.normal(k_c, (batch, d_cond), jnp.float32)
    params = init_params(k_p, dim, hidden_dim, d_cond)

    z, logdet = jax.block_until_ready(
        conditional_affine_coupling_forward(x, c, params))

    z_ref, logdet_ref = reference_forward(x, c, params)
    np.testing.assert_allclose(np.asarray(z), np.asarray(z_ref),
                               rtol=1e-4, atol=1e-4)
    np.testing.assert_allclose(np.asarray(logdet), np.asarray(logdet_ref),
                               rtol=1e-4, atol=1e-4)

    print("KERNEL_OK")
</pallas_src>

<mosaic_0001>
module attributes {stable_mosaic.version = 11 : i64} {
  func.func @_coupling_kernel(%arg0: i32, %arg1: memref<8x128xf32, #tpu.memory_space<vmem>>, %arg2: memref<8x128xf32, #tpu.memory_space<vmem>>, %arg3: memref<8x128xf32, #tpu.memory_space<vmem>>, %arg4: memref<128x256xf32, #tpu.memory_space<vmem>>, %arg5: memref<128x256xf32, #tpu.memory_space<vmem>>, %arg6: memref<1x256xf32, #tpu.memory_space<vmem>>, %arg7: memref<256x256xf32, #tpu.memory_space<vmem>>, %arg8: memref<1x256xf32, #tpu.memory_space<vmem>>, %arg9: memref<8x128xf32, #tpu.memory_space<vmem>>, %arg10: memref<8x128xf32, #tpu.memory_space<vmem>>) attributes {dimension_semantics = [#tpu.dimension_semantics<parallel>], iteration_bounds = array<i64: 1>, scalar_prefetch = 0 : i64, scratch_operands = 0 : i64, tpu.core_type = #tpu.core_type<tc>, window_params = [{transform_indices = @transform_0, window_bounds = array<i64: 8, 128>}, {transform_indices = @transform_1, window_bounds = array<i64: 8, 128>}, {transform_indices = @transform_2, window_bounds = array<i64: 8, 128>}, {pipeline_mode = #tpu.pipeline_mode<synchronous>, transform_indices = @transform_3, window_bounds = array<i64: 128, 256>}, {pipeline_mode = #tpu.pipeline_mode<synchronous>, transform_indices = @transform_4, window_bounds = array<i64: 128, 256>}, {pipeline_mode = #tpu.pipeline_mode<synchronous>, transform_indices = @transform_5, window_bounds = array<i64: 1, 256>}, {pipeline_mode = #tpu.pipeline_mode<synchronous>, transform_indices = @transform_6, window_bounds = array<i64: 256, 256>}, {pipeline_mode = #tpu.pipeline_mode<synchronous>, transform_indices = @transform_7, window_bounds = array<i64: 1, 256>}, {transform_indices = @transform_8, window_bounds = array<i64: 8, 128>}, {transform_indices = @transform_9, window_bounds = array<i64: 8, 128>}]} {
    %c0 = arith.constant 0 : index
    %c0_0 = arith.constant 0 : index
    %0 = vector.load %arg1[%c0, %c0_0] : memref<8x128xf32, #tpu.memory_space<vmem>>, vector<8x128xf32>
    %c0_1 = arith.constant 0 : index
    %c0_2 = arith.constant 0 : index
    %1 = vector.load %arg4[%c0_1, %c0_2] : memref<128x256xf32, #tpu.memory_space<vmem>>, vector<128x256xf32>
    %cst = arith.constant dense<0.000000e+00> : vector<8x256xf32>
    %2 = tpu.matmul %0, %1, %cst {dimension_numbers = #tpu.dot_dimension_numbers<[1], [0], [0], [1], [0, 0, 1, 1], [], []>} : vector<8x128xf32>, vector<128x256xf32>, vector<8x256xf32> -> vector<8x256xf32>
    %c0_3 = arith.constant 0 : index
    %c0_4 = arith.constant 0 : index
    %3 = vector.load %arg2[%c0_3, %c0_4] : memref<8x128xf32, #tpu.memory_space<vmem>>, vector<8x128xf32>
    %c0_5 = arith.constant 0 : index
    %c0_6 = arith.constant 0 : index
    %4 = vector.load %arg5[%c0_5, %c0_6] : memref<128x256xf32, #tpu.memory_space<vmem>>, vector<128x256xf32>
    %cst_7 = arith.constant dense<0.000000e+00> : vector<8x256xf32>
    %5 = tpu.matmul %3, %4, %cst_7 {dimension_numbers = #tpu.dot_dimension_numbers<[1], [0], [0], [1], [0, 0, 1, 1], [], []>} : vector<8x128xf32>, vector<128x256xf32>, vector<8x256xf32> -> vector<8x256xf32>
    %6 = arith.addf %2, %5 : vector<8x256xf32>
    %c0_8 = arith.constant 0 : index
    %c0_9 = arith.constant 0 : index
    %7 = vector.load %arg6[%c0_8, %c0_9] : memref<1x256xf32, #tpu.memory_space<vmem>>, vector<1x256xf32>
    %8 = vector.broadcast %7 : vector<1x256xf32> to vector<8x256xf32>
    %9 = arith.addf %6, %8 : vector<8x256xf32>
    %cst_10 = arith.constant 0.000000e+00 : f32
    %10 = vector.broadcast %cst_10 : f32 to vector<8x256xf32>
    %11 = arith.maximumf %9, %10 : vector<8x256xf32>
    %c0_11 = arith.constant 0 : index
    %c0_12 = arith.constant 0 : index
    %12 = vector.load %arg7[%c0_11, %c0_12] : memref<256x256xf32, #tpu.memory_space<vmem>>, vector<256x256xf32>
    %cst_13 = arith.constant dense<0.000000e+00> : vector<8x256xf32>
    %13 = tpu.matmul %11, %12, %cst_13 {dimension_numbers = #tpu.dot_dimension_numbers<[1], [0], [0], [1], [0, 0, 1, 1], [], []>} : vector<8x256xf32>, vector<256x256xf32>, vector<8x256xf32> -> vector<8x256xf32>
    %c0_14 = arith.constant 0 : index
    %c0_15 = arith.constant 0 : index
    %14 = vector.load %arg8[%c0_14, %c0_15] : memref<1x256xf32, #tpu.memory_space<vmem>>, vector<1x256xf32>
    %15 = vector.broadcast %14 : vector<1x256xf32> to vector<8x256xf32>
    %16 = arith.addf %13, %15 : vector<8x256xf32>
    %17 = vector.extract_strided_slice %16 {offsets = [0, 0], sizes = [8, 128], strides = [1, 1]} : vector<8x256xf32> to vector<8x128xf32>
    %18 = math.tanh %17 : vector<8x128xf32>
    %19 = vector.extract_strided_slice %16 {offsets = [0, 128], sizes = [8, 128], strides = [1, 1]} : vector<8x256xf32> to vector<8x128xf32>
    %c0_16 = arith.constant 0 : index
    %c0_17 = arith.constant 0 : index
    %20 = vector.load %arg3[%c0_16, %c0_17] : memref<8x128xf32, #tpu.memory_space<vmem>>, vector<8x128xf32>
    %21 = math.exp %18 : vector<8x128xf32>
    %22 = arith.mulf %20, %21 : vector<8x128xf32>
    %23 = arith.addf %22, %19 : vector<8x128xf32>
    %c0_18 = arith.constant 0 : index
    %c0_19 = arith.constant 0 : index
    %24 = vector.load %arg9[%c0_18, %c0_19] : memref<8x128xf32, #tpu.memory_space<vmem>>, vector<8x128xf32>
    tpu.vector_store %arg9[%c0_18, %c0_19], %23 {strides = array<i32>} : memref<8x128xf32, #tpu.memory_space<vmem>>, vector<8x128xf32>,
    %cst_20 = arith.constant dense<0.000000e+00> : vector<8xf32>
    %25 = vector.multi_reduction <add>, %18, %cst_20 [1] : vector<8x128xf32> to vector<8xf32>
    %26 = vector.shape_cast %25 : vector<8xf32> to vector<8x1xf32>
    %27 = vector.shape_cast %26 : vector<8x1xf32> to vector<8x1xf32>
    %28 = vector.broadcast %27 : vector<8x1xf32> to vector<8x128xf32>
    %c0_21 = arith.constant 0 : index
    %c0_22 = arith.constant 0 : index
    %29 = vector.load %arg10[%c0_21, %c0_22] : memref<8x128xf32, #tpu.memory_space<vmem>>, vector<8x128xf32>
    tpu.vector_store %arg10[%c0_21, %c0_22], %28 {strides = array<i32>} : memref<8x128xf32, #tpu.memory_space<vmem>>, vector<8x128xf32>,
    return
  }
  func.func @transform_0(%arg0: i32) -> (i32, i32) {
    %c0_i32 = arith.constant 0 : i32
    %c0_i32_0 = arith.constant 0 : i32
    return %arg0, %c0_i32 : i32, i32
  }
  func.func @transform_1(%arg0: i32) -> (i32, i32) {
    %c0_i32 = arith.constant 0 : i32
    %c0_i32_0 = arith.constant 0 : i32
    return %arg0, %c0_i32 : i32, i32
  }
  func.func @transform_2(%arg0: i32) -> (i32, i32) {
    %c0_i32 = arith.constant 0 : i32
    %c0_i32_0 = arith.constant 0 : i32
    return %arg0, %c0_i32 : i32, i32
  }
  func.func @transform_3(%arg0: i32) -> (i32, i32) {
    %c0_i32 = arith.constant 0 : i32
    %c0_i32_0 = arith.constant 0 : i32
    %c0_i32_1 = arith.constant 0 : i32
    return %c0_i32, %c0_i32_0 : i32, i32
  }
  func.func @transform_4(%arg0: i32) -> (i32, i32) {
    %c0_i32 = arith.constant 0 : i32
    %c0_i32_0 = arith.constant 0 : i32
    %c0_i32_1 = arith.constant 0 : i32
    return %c0_i32, %c0_i32_0 : i32, i32
  }
  func.func @transform_5(%arg0: i32) -> (i32, i32) {
    %c0_i32 = arith.constant 0 : i32
    %c0_i32_0 = arith.constant 0 : i32
    %c0_i32_1 = arith.constant 0 : i32
    return %c0_i32, %c0_i32_0 : i32, i32
  }
  func.func @transform_6(%arg0: i32) -> (i32, i32) {
    %c0_i32 = arith.constant 0 : i32
    %c0_i32_0 = arith.constant 0 : i32
    %c0_i32_1 = arith.constant 0 : i32
    return %c0_i32, %c0_i32_0 : i32, i32
  }
  func.func @transform_7(%arg0: i32) -> (i32, i32) {
    %c0_i32 = arith.constant 0 : i32
    %c0_i32_0 = arith.constant 0 : i32
    %c0_i32_1 = arith.constant 0 : i32
    return %c0_i32, %c0_i32_0 : i32, i32
  }
  func.func @transform_8(%arg0: i32) -> (i32, i32) {
    %c0_i32 = arith.constant 0 : i32
    %c0_i32_0 = arith.constant 0 : i32
    return %arg0, %c0_i32 : i32, i32
  }
  func.func @transform_9(%arg0: i32) -> (i32, i32) {
    %c0_i32 = arith.constant 0 : i32
    %c0_i32_0 = arith.constant 0 : i32
    return %arg0, %c0_i32 : i32, i32
  }
}

</mosaic_0001>

<bundles_post_ra>
// kernel: tpu_custom_call.1
= control target key start
LH: loop header
LB: loop body
LE: loop exit
PB: predicated region body
PF: predicated region fallthrough
CT: control target
= control target key end

     0   :  { %15 = vsyncpa [#allocation3], 0  ;;  %s1043_s0 = inlined_call_operand.hbm [shape: f32[8,128], index: 0, kind: input, shape index: {}]   ;;  %s1044_s1 = inlined_call_operand.hbm [shape: f32[8,128], index: 1, kind: input, shape index: {}]   ;;  %s1045_s2 = inlined_call_operand.hbm [shape: f32[8,128], index: 2, kind: input, shape index: {}]   ;;  %s1046_s3 = inlined_call_operand.hbm [shape: f32[128,256], index: 3, kind: input, shape index: {}]   ;;  %s1047_s4 = inlined_call_operand.hbm [shape: f32[128,256], index: 4, kind: input, shape index: {}]   ;;  %s1048_s5 = inlined_call_operand.vmem [shape: f32[1,256], index: 5, kind: input, shape index: {}]   ;;  %s1049_s6 = inlined_call_operand.hbm [shape: f32[256,256], index: 6, kind: input, shape index: {}]   ;;  %s1050_s7 = inlined_call_operand.vmem [shape: f32[1,256], index: 7, kind: input, shape index: {}]   ;;  %s1051_s8 = inlined_call_operand.hbm [shape: f32[8,128], index: 8, kind: output, shape index: {0}]   ;;  %s1052_s9 = inlined_call_operand.hbm [shape: f32[8,128], index: 9, kind: output, shape index: {1}]  }
   0x1   :  { %16 = vsyncpa [#allocation6], 0 }
   0x2   :  { %17 = vsyncpa [#allocation9], 0 }
   0x3   :  { %18 = vsyncpa [#allocation12], 0 }
   0x4   :  { %19 = vsyncpa [#allocation4], 0 }
   0x5   :  { %20 = vsyncpa [#allocation15], 0  ;;  %s855_s30 = smov [#allocation5]   ;;  %s856_s11 = smov [#allocation8]  }
   0x6   :  { %s37_s10 = sshll.u32 %s855_s30, 4  ;;  %s56_s12 = sshll.u32 %s856_s11, 4  ;;  %s38_s10 = int_to_ptr.vmem [resolvable:$true] %s37_s10  ;;  %s916_s12 = int_to_ptr.vmem [resolvable:$true] %s56_s12 }
   0x7   :  { %s667_s15 = scalar_lea.hbm %s1044_s1, 128 }
   0x8   :  { %p668_p0 = scmp.ne.s32.totalorder %s1044_s1, %s667_s15  ;;  %p671_p1 = scmp.lt.u32.totalorder %s667_s15, %s1044_s1 }
   0xa   :  { %p673_p2 = pnand %p671_p1, %p668_p0 }
   0xc   :  { %676 = shalt.err (!%p673_p2)
}
   0xd   :  { %s677_s20 = scalar_lea.vmem %s38_s10, 128  ;;  %p682_p4 = scmp.lt.s32.totalorder %s38_s10, %s38_s10 }
   0xe   :  { %p678_p3 = scmp.ne.s32.totalorder %s38_s10, %s677_s20  ;;  %p683_p5 = scmp.lt.s32.totalorder %s677_s20, %s677_s20 }
  0x10   :  { %p684_p6 = por %p683_p5, %p682_p4 }
  0x12   :  { %p685_p7 = pnand %p684_p6, %p678_p3 }
  0x14   :  { %688 = shalt.err (!%p685_p7)
}
  0x15   :  { %40 = dma.hbm_to_vmem [thread:$0]  %s1044_s1, 128, %s38_s10, [#allocation6]  }
  0x16   :  { %s689_s25 = scalar_lea.hbm %s1046_s3, 4096 }
  0x17   :  { %p690_p8 = scmp.ne.s32.totalorder %s1046_s3, %s689_s25  ;;  %p693_p9 = scmp.lt.u32.totalorder %s689_s25, %s1046_s3 }
  0x19   :  { %p695_p10 = pnand %p693_p9, %p690_p8 }
  0x1b   :  { %698 = shalt.err (!%p695_p10)
}
  0x1c   :  { %s699_s30 = scalar_lea.vmem %s916_s12, 4096  ;;  %p704_p12 = scmp.lt.s32.totalorder %s916_s12, %s916_s12 }
  0x1d   :  { %p700_p11 = scmp.ne.s32.totalorder %s916_s12, %s699_s30  ;;  %p705_p13 = scmp.lt.s32.totalorder %s699_s30, %s699_s30 }
  0x1f   :  { %p706_p0 = por %p705_p13, %p704_p12 }
  0x21   :  { %p707_p1 = pnand %p706_p0, %p700_p11 }
  0x23   :  { %710 = shalt.err (!%p707_p1)
}
  0x24   :  { %s857_s1 = smov 256   ;;  %s858_s10 = smov 16  }
  0x25   :  { %62 = dma.hbm_to_vmem [thread:$0]  %s1046_s3, 4096, %s916_s12, [#allocation9], %s857_s1, %s857_s1, %s858_s10  }
  0x26   :  { %s859_s14 = smov [#allocation2]   ;;  %s860_s16 = smov [#allocation7]  }
  0x27   :  { %s27_s15 = sshll.u32 %s859_s14, 4  ;;  %s47_s17 = sshll.u32 %s860_s16, 4  ;;  %s28_s15 = int_to_ptr.vmem [resolvable:$true] %s27_s15  ;;  %s48_s17 = int_to_ptr.vmem [resolvable:$true] %s47_s17 }
  0x28   :  { %s711_s20 = scalar_lea.hbm %s1043_s0, 128 }
  0x29   :  { %p712_p2 = scmp.ne.s32.totalorder %s1043_s0, %s711_s20  ;;  %p715_p3 = scmp.lt.u32.totalorder %s711_s20, %s1043_s0 }
  0x2b   :  { %p717_p4 = pnand %p715_p3, %p712_p2 }
  0x2d   :  { %720 = shalt.err (!%p717_p4)
}
  0x2e   :  { %s721_s3 = scalar_lea.vmem %s28_s15, 128  ;;  %p726_p6 = scmp.lt.s32.totalorder %s28_s15, %s28_s15 }
  0x2f   :  { %p722_p5 = scmp.ne.s32.totalorder %s28_s15, %s721_s3  ;;  %p727_p7 = scmp.lt.s32.totalorder %s721_s3, %s721_s3 }
  0x31   :  { %p728_p8 = por %p727_p7, %p726_p6 }
  0x33   :  { %p729_p9 = pnand %p728_p8, %p722_p5 }
  0x35   :  { %732 = shalt.err (!%p729_p9)
}
  0x36   :  { %30 = dma.hbm_to_vmem [thread:$0]  %s1043_s0, 128, %s28_s15, [#allocation3]  }
  0x37   :  { %s733_s28 = scalar_lea.hbm %s1045_s2, 128 }
  0x38   :  { %p734_p10 = scmp.ne.s32.totalorder %s1045_s2, %s733_s28  ;;  %p737_p11 = scmp.lt.u32.totalorder %s733_s28, %s1045_s2 }
  0x3a   :  { %p739_p12 = pnand %p737_p11, %p734_p10 }
  0x3c   :  { %742 = shalt.err (!%p739_p12)
}
  0x3d   :  { %s743_s14 = scalar_lea.vmem %s48_s17, 128  ;;  %p748_p0 = scmp.lt.s32.totalorder %s48_s17, %s48_s17 }
  0x3e   :  { %p744_p13 = scmp.ne.s32.totalorder %s48_s17, %s743_s14  ;;  %p749_p1 = scmp.lt.s32.totalorder %s743_s14, %s743_s14 }
  0x40   :  { %p750_p2 = por %p749_p1, %p748_p0 }
  0x42   :  { %p751_p3 = pnand %p750_p2, %p744_p13 }
  0x44   :  { %754 = shalt.err (!%p751_p3)
}
  0x45   :  { %50 = dma.hbm_to_vmem [thread:$0]  %s1045_s2, 128, %s48_s17, [#allocation6]  }
  0x46   :  { %s861_s16 = smov [#allocation10]   ;;  %s862_s19 = smov [#allocation11]  }
  0x47   :  { %s68_s18 = sshll.u32 %s861_s16, 4  ;;  %s82_s20 = sshll.u32 %s862_s19, 4  ;;  %s69_s18 = int_to_ptr.vmem [resolvable:$true] %s68_s18  ;;  %s974_s20 = int_to_ptr.vmem [resolvable:$true] %s82_s20 }
  0x48   :  { %s755_s23 = scalar_lea.hbm %s1047_s4, 4096 }
  0x49   :  { %p756_p4 = scmp.ne.s32.totalorder %s1047_s4, %s755_s23  ;;  %p759_p5 = scmp.lt.u32.totalorder %s755_s23, %s1047_s4 }
  0x4b   :  { %p761_p6 = pnand %p759_p5, %p756_p4 }
  0x4d   :  { %764 = shalt.err (!%p761_p6)
}
  0x4e   :  { %s765_s2 = scalar_lea.vmem %s69_s18, 4096  ;;  %p770_p8 = scmp.lt.s32.totalorder %s69_s18, %s69_s18 }
  0x4f   :  { %p766_p7 = scmp.ne.s32.totalorder %s69_s18, %s765_s2  ;;  %p771_p9 = scmp.lt.s32.totalorder %s765_s2, %s765_s2 }
  0x51   :  { %p772_p10 = por %p771_p9, %p770_p8 }
  0x53   :  { %p773_p11 = pnand %p772_p10, %p766_p7 }
  0x55   :  { %776 = shalt.err (!%p773_p11)
}
  0x56   :  { %74 = dma.hbm_to_vmem [thread:$0]  %s1047_s4, 4096, %s69_s18, [#allocation9], %s857_s1, %s857_s1, %s858_s10  }
  0x57   :  { %s777_s29 = scalar_lea.hbm %s1049_s6, 8192 }
  0x58   :  { %p778_p12 = scmp.ne.s32.totalorder %s1049_s6, %s777_s29  ;;  %p781_p13 = scmp.lt.u32.totalorder %s777_s29, %s1049_s6 }
  0x5a   :  { %p783_p0 = pnand %p781_p13, %p778_p12 }
  0x5c   :  { %786 = shalt.err (!%p783_p0)
}
  0x5d   :  { %s787_s0 = scalar_lea.vmem %s974_s20, 8192  ;;  %p792_p2 = scmp.lt.s32.totalorder %s974_s20, %s974_s20 }
  0x5e   :  { %p788_p1 = scmp.ne.s32.totalorder %s974_s20, %s787_s0  ;;  %p793_p3 = scmp.lt.s32.totalorder %s787_s0, %s787_s0 }
  0x60   :  { %p794_p4 = por %p793_p3, %p792_p2 }
  0x62   :  { %p795_p5 = pnand %p794_p4, %p788_p1 }
  0x64   :  { %798 = shalt.err (!%p795_p5)
}
  0x65   :  { %88 = dma.hbm_to_vmem [thread:$0]  %s1049_s6, 8192, %s974_s20, [#allocation12], %s857_s1, %s857_s1, %s858_s10  }
  0x66   :  { %843 = dma.done.wait [#allocation3], 128  }
  0x67   :  { %844 = vsyncadd [#allocation3], 4294967168 }
  0x68   :  { %845 = dma.done.wait [#allocation6], 256  }
  0x69   :  { %846 = vsyncadd [#allocation6], 4294967040 }
  0x6a   :  { %847 = dma.done.wait [#allocation9], 8192  }
  0x6b   :  { %848 = vsyncadd [#allocation9], 4294959104 }
  0x6c   :  { %849 = dma.done.wait [#allocation12], 8192  }
  0x6d   :  { %850 = vsyncadd [#allocation12], 4294959104  ;;  %v863_v0 = vmov 0.0   ;;  %v144_v1 = vld [vmem:[#allocation10 + $0x8] sm:$0xff]  ;;  %v146_v2 = vld [vmem:[#allocation10 + $0x18] sm:$0xff] }
  0x6e   :  { %239 = vmatprep.mubr.f32.mxu0 %v863_v0  ;;  %v143_v3 = vld [vmem:[#allocation10] sm:$0xff]  ;;  %v522_v4 = vpack.c.bf16 %v146_v2, %v144_v1  ;;  %v145_v5 = vld [vmem:[#allocation10 + $0x10] sm:$0xff]  ;;  %v148_v6 = vld [vmem:[#allocation10 + $0x28] sm:$0xff] }
  0x6f   :  { %v150_v7 = vld [vmem:[#allocation10 + $0x38] sm:$0xff]  ;;  %v524_v8 = vpack.c.bf16 %v145_v5, %v143_v3  ;;  %v147_v10 = vld [vmem:[#allocation10 + $0x20] sm:$0xff]  ;;  %v149_v11 = vld [vmem:[#allocation10 + $0x30] sm:$0xff] }
  0x70   :  { %v526_v9 = vpack.c.bf16 %v150_v7, %v148_v6  ;;  %v152_v12 = vld [vmem:[#allocation10 + $0x48] sm:$0xff]  ;;  %523 = vmatprep.subr.bf16.mxu0 %v522_v4  ;;  %v154_v13 = vld [vmem:[#allocation10 + $0x58] sm:$0xff]  ;;  %v528_v14 = vpack.c.bf16 %v149_v11, %v147_v10  ;;  %v151_v16 = vld [vmem:[#allocation10 + $0x40] sm:$0xff] }
  0x71   :  { %525 = vmatpush1.bf16.msra.mxu0 %v524_v8  ;;  %v530_v15 = vpack.c.bf16 %v154_v13, %v152_v12  ;;  %v153_v17 = vld [vmem:[#allocation10 + $0x50] sm:$0xff]  ;;  %v156_v18 = vld [vmem:[#allocation10 + $0x68] sm:$0xff]  ;;  %v158_v19 = vld [vmem:[#allocation10 + $0x78] sm:$0xff] }
  0x72   :  { %527 = vmatprep.subr.bf16.mxu0 %v526_v9  ;;  %v532_v20 = vpack.c.bf16 %v153_v17, %v151_v16  ;;  %v534_v21 = vpack.c.bf16 %v158_v19, %v156_v18  ;;  %v155_v22 = vld [vmem:[#allocation10 + $0x60] sm:$0xff]  ;;  %v157_v23 = vld [vmem:[#allocation10 + $0x70] sm:$0xff]  ;;  %v160_v24 = vld [vmem:[#allocation10 + $0x88] sm:$0xff] }
  0x73   :  { %v162_v25 = vld [vmem:[#allocation10 + $0x98] sm:$0xff]  ;;  %v536_v26 = vpack.c.bf16 %v157_v23, %v155_v22  ;;  %v159_v28 = vld [vmem:[#allocation10 + $0x80] sm:$0xff]  ;;  %v161_v29 = vld [vmem:[#allocation10 + $0x90] sm:$0xff] }
  0x74   :  { %v538_v27 = vpack.c.bf16 %v162_v25, %v160_v24  ;;  %v164_v30 = vld [vmem:[#allocation10 + $0xa8] sm:$0xff]  ;;  %v166_v31 = vld [vmem:[#allocation10 + $0xb8] sm:$0xff]  ;;  %v540_v32 = vpack.c.bf16 %v161_v29, %v159_v28  ;;  %v163_v34 = vld [vmem:[#allocation10 + $0xa0] sm:$0xff] }
  0x75   :  { %529 = vmatpush1.bf16.msra.mxu0 %v528_v14  ;;  %v542_v33 = vpack.c.bf16 %v166_v31, %v164_v30  ;;  %v165_v35 = vld [vmem:[#allocation10 + $0xb0] sm:$0xff]  ;;  %v168_v36 = vld [vmem:[#allocation10 + $0xc8] sm:$0xff]  ;;  %v170_v37 = vld [vmem:[#allocation10 + $0xd8] sm:$0xff] }
  0x76   :  { %531 = vmatprep.subr.bf16.mxu0 %v530_v15  ;;  %v544_v38 = vpack.c.bf16 %v165_v35, %v163_v34  ;;  %v167_v39 = vld [vmem:[#allocation10 + $0xc0] sm:$0xff]  ;;  %v546_v40 = vpack.c.bf16 %v170_v37, %v168_v36  ;;  %v169_v41 = vld [vmem:[#allocation10 + $0xd0] sm:$0xff]  ;;  %v172_v42 = vld [vmem:[#allocation10 + $0xe8] sm:$0xff] }
  0x77   :  { %v174_v43 = vld [vmem:[#allocation10 + $0xf8] sm:$0xff]  ;;  %v334_v44 = vld [vmem:[#allocation11 + $0x8] sm:$0xff]  ;;  %v333_v46 = vld [vmem:[#allocation11] sm:$0xff]  ;;  %v548_v51 = vpack.c.bf16 %v169_v41, %v167_v39 }
  0x78   :  { %v336_v45 = vld [vmem:[#allocation11 + $0x18] sm:$0xff]  ;;  %v335_v48 = vld [vmem:[#allocation11 + $0x10] sm:$0xff]  ;;  %v338_v49 = vld [vmem:[#allocation11 + $0x28] sm:$0xff]  ;;  %v550_v57 = vpack.c.bf16 %v174_v43, %v172_v42 }
  0x79   :  { %533 = vmatpush1.bf16.msra.mxu0 %v532_v20  ;;  %v586_v47 = vpack.c.bf16 %v336_v45, %v334_v44  ;;  %v340_v50 = vld [vmem:[#allocation11 + $0x38] sm:$0xff]  ;;  %v588_v52 = vpack.c.bf16 %v335_v48, %v333_v46  ;;  %v337_v54 = vld [vmem:[#allocation11 + $0x20] sm:$0xff]  ;;  %v339_v55 = vld [vmem:[#allocation11 + $0x30] sm:$0xff] }
  0x7a   :  { %535 = vmatprep.subr.bf16.mxu0 %v534_v21  ;;  %v590_v53 = vpack.c.bf16 %v340_v50, %v338_v49  ;;  %v342_v56 = vld [vmem:[#allocation11 + $0x48] sm:$0xff]  ;;  %v171_v58 = vld [vmem:[#allocation10 + $0xe0] sm:$0xff]  ;;  %v173_v59 = vld [vmem:[#allocation10 + $0xf0] sm:$0xff]  ;;  %v592_v63 = vpack.c.bf16 %v339_v55, %v337_v54 }
  0x7b   :  { %587 = vmatprep.subr.bf16.mxu1 %v586_v47  ;;  %v344_v60 = vld [vmem:[#allocation11 + $0x58] sm:$0xff]  ;;  %v111_v61 = vld [vmem:[#allocation8 + $0x8] sm:$0xff]  ;;  %v341_v2 = vld [vmem:[#allocation11 + $0x40] sm:$0xff]  ;;  %v552_v4 = vpack.c.bf16 %v173_v59, %v171_v58 }
  0x7c   :  { %v113_v62 = vld [vmem:[#allocation8 + $0x18] sm:$0xff]  ;;  %589 = vmatpush1.bf16.msra.mxu1 %v588_v52  ;;  %v594_v1 = vpack.c.bf16 %v344_v60, %v342_v56  ;;  %v343_v3 = vld [vmem:[#allocation11 + $0x50] sm:$0xff]  ;;  %v346_v5 = vld [vmem:[#allocation11 + $0x68] sm:$0xff] }
  0x7d   :  { %537 = vmatpush1.bf16.msra.mxu0 %v536_v26  ;;  %591 = vmatprep.subr.bf16.mxu1 %v590_v53  ;;  %v348_v6 = vld [vmem:[#allocation11 + $0x78] sm:$0xff]  ;;  %v554_v7 = vpack.c.bf16 %v113_v62, %v111_v61  ;;  %v110_v8 = vld [vmem:[#allocation8] sm:$0xff]  ;;  %v112_v9 = vld [vmem:[#allocation8 + $0x10] sm:$0xff]  ;;  %v596_v12 = vpack.c.bf16 %v343_v3, %v341_v2 }
  0x7e   :  { %539 = vmatprep.subr.bf16.mxu0 %v538_v27  ;;  %v115_v10 = vld [vmem:[#allocation8 + $0x28] sm:$0xff]  ;;  %v117_v11 = vld [vmem:[#allocation8 + $0x38] sm:$0xff]  ;;  %v598_v13 = vpack.c.bf16 %v348_v6, %v346_v5  ;;  %v345_v14 = vld [vmem:[#allocation11 + $0x60] sm:$0xff]  ;;  %v556_v17 = vpack.c.bf16 %v112_v9, %v110_v8 }
  0x7f   :  { %v347_v15 = vld [vmem:[#allocation11 + $0x70] sm:$0xff]  ;;  %v350_v18 = vld [vmem:[#allocation11 + $0x88] sm:$0xff]  ;;  %v352_v19 = vld [vmem:[#allocation11 + $0x98] sm:$0xff]  ;;  %v558_v20 = vpack.c.bf16 %v117_v11, %v115_v10 }
  0x80   :  { %593 = vmatpush1.bf16.msra.mxu1 %v592_v63  ;;  %v142_v16 = vld [vmem:[#allocation5] sm:$0xff]  ;;  %v114_v21 = vld [vmem:[#allocation8 + $0x20] sm:$0xff]  ;;  %v119_v23 = vld [vmem:[#allocation8 + $0x48] sm:$0xff]  ;;  %v600_v25 = vpack.c.bf16 %v347_v15, %v345_v14  ;;  %v602_v26 = vpack.c.bf16 %v352_v19, %v350_v18 }
  0x81   :  { %541 = vmatpush1.bf16.msra.mxu0 %v540_v32  ;;  %595 = vmatprep.subr.bf16.mxu1 %v594_v1  ;;  %v116_v22 = vld [vmem:[#allocation8 + $0x30] sm:$0xff]  ;;  %v121_v24 = vld [vmem:[#allocation8 + $0x58] sm:$0xff]  ;;  %v349_v27 = vld [vmem:[#allocation11 + $0x80] sm:$0xff] }
  0x82   :  { %543 = vmatprep.subr.bf16.mxu0 %v542_v33  ;;  %v351_v28 = vld [vmem:[#allocation11 + $0x90] sm:$0xff]  ;;  %v560_v29 = vpack.c.bf16 %v116_v22, %v114_v21  ;;  %v354_v30 = vld [vmem:[#allocation11 + $0xa8] sm:$0xff]  ;;  %v356_v31 = vld [vmem:[#allocation11 + $0xb8] sm:$0xff]  ;;  %v562_v32 = vpack.c.bf16 %v121_v24, %v119_v23 }
  0x83   :  { %v118_v33 = vld [vmem:[#allocation8 + $0x40] sm:$0xff]  ;;  %v120_v34 = vld [vmem:[#allocation8 + $0x50] sm:$0xff]  ;;  %v123_v35 = vld [vmem:[#allocation8 + $0x68] sm:$0xff]  ;;  %v604_v37 = vpack.c.bf16 %v351_v28, %v349_v27 }
  0x84   :  { %597 = vmatpush1.bf16.msra.mxu1 %v596_v12  ;;  %v125_v36 = vld [vmem:[#allocation8 + $0x78] sm:$0xff]  ;;  %v353_v39 = vld [vmem:[#allocation11 + $0xa0] sm:$0xff]  ;;  %v564_v41 = vpack.c.bf16 %v120_v34, %v118_v33  ;;  %v358_v42 = vld [vmem:[#allocation11 + $0xc8] sm:$0xff] }
  0x85   :  { %545 = vmatpush1.bf16.msra.mxu0 %v544_v38  ;;  %599 = vmatprep.subr.bf16.mxu1 %v598_v13  ;;  %v606_v38 = vpack.c.bf16 %v356_v31, %v354_v30  ;;  %v360_v43 = vld [vmem:[#allocation11 + $0xd8] sm:$0xff]  ;;  %v122_v44 = vld [vmem:[#allocation8 + $0x60] sm:$0xff]  ;;  %v124_v45 = vld [vmem:[#allocation8 + $0x70] sm:$0xff] }
  0x86   :  { %547 = vmatprep.subr.bf16.mxu0 %v546_v40  ;;  %v355_v40 = vld [vmem:[#allocation11 + $0xb0] sm:$0xff]  ;;  %v127_v46 = vld [vmem:[#allocation8 + $0x88] sm:$0xff]  ;;  %v129_v47 = vld [vmem:[#allocation8 + $0x98] sm:$0xff]  ;;  %v610_v49 = vpack.c.bf16 %v360_v43, %v358_v42  ;;  %v568_v52 = vpack.c.bf16 %v124_v45, %v122_v44 }
  0x87   :  { %v608_v48 = vpack.c.bf16 %v355_v40, %v353_v39  ;;  %v357_v50 = vld [vmem:[#allocation11 + $0xc0] sm:$0xff]  ;;  %v362_v53 = vld [vmem:[#allocation11 + $0xe8] sm:$0xff]  ;;  %v364_v54 = vld [vmem:[#allocation11 + $0xf8] sm:$0xff]  ;;  %v570_v55 = vpack.c.bf16 %v129_v47, %v127_v46 }
  0x88   :  { %601 = vmatpush1.bf16.msra.mxu1 %v600_v25  ;;  %v126_v56 = vld [vmem:[#allocation8 + $0x80] sm:$0xff]  ;;  %v131_v58 = vld [vmem:[#allocation8 + $0xa8] sm:$0xff]  ;;  %v133_v59 = vld [vmem:[#allocation8 + $0xb8] sm:$0xff]  ;;  %v614_v61 = vpack.c.bf16 %v364_v54, %v362_v53 }
  0x89   :  { %549 = vmatpush1.bf16.msra.mxu0 %v548_v51  ;;  %603 = vmatprep.subr.bf16.mxu1 %v602_v26  ;;  %v359_v51 = vld [vmem:[#allocation11 + $0xd0] sm:$0xff]  ;;  %v361_v62 = vld [vmem:[#allocation11 + $0xe0] sm:$0xff]  ;;  %v366_v2 = vld [vmem:[#allocation11 + $0x108] sm:$0xff] }
  0x8a   :  { %551 = vmatprep.subr.bf16.mxu0 %v550_v57  ;;  %v128_v57 = vld [vmem:[#allocation8 + $0x90] sm:$0xff]  ;;  %v612_v60 = vpack.c.bf16 %v359_v51, %v357_v50  ;;  %v368_v3 = vld [vmem:[#allocation11 + $0x118] sm:$0xff]  ;;  %v130_v5 = vld [vmem:[#allocation8 + $0xa0] sm:$0xff] }
  0x8b   :  { %v363_v63 = vld [vmem:[#allocation11 + $0xf0] sm:$0xff]  ;;  %v572_v1 = vpack.c.bf16 %v128_v57, %v126_v56  ;;  %v137_v8 = vld [vmem:[#allocation8 + $0xd8] sm:$0xff]  ;;  %v618_v10 = vpack.c.bf16 %v368_v3, %v366_v2  ;;  %v365_v11 = vld [vmem:[#allocation11 + $0x100] sm:$0xff] }
  0x8c   :  { %605 = vmatpush1.bf16.msra.mxu1 %v604_v37  ;;  %v132_v6 = vld [vmem:[#allocation8 + $0xb0] sm:$0xff]  ;;  %v616_v9 = vpack.c.bf16 %v363_v63, %v361_v62  ;;  %v370_v14 = vld [vmem:[#allocation11 + $0x128] sm:$0xff]  ;;  %v372_v15 = vld [vmem:[#allocation11 + $0x138] sm:$0xff] }
  0x8d   :  { %553 = vmatpush1.bf16.msra.mxu0 %v552_v4  ;;  %607 = vmatprep.subr.bf16.mxu1 %v606_v38  ;;  %v574_v4 = vpack.c.bf16 %v133_v59, %v131_v58  ;;  %v367_v12 = vld [vmem:[#allocation11 + $0x110] sm:$0xff]  ;;  %v576_v13 = vpack.c.bf16 %v132_v6, %v130_v5  ;;  %v139_v19 = vld [vmem:[#allocation8 + $0xe8] sm:$0xff]  ;;  %v622_v22 = vpack.c.bf16 %v372_v15, %v370_v14  ;;  %v369_v23 = vld [vmem:[#allocation11 + $0x120] sm:$0xff] }
  0x8e   :  { %555 = vmatprep.subr.bf16.mxu0 %v554_v7  ;;  %v135_v7 = vld [vmem:[#allocation8 + $0xc8] sm:$0xff]  ;;  %v136_v18 = vld [vmem:[#allocation8 + $0xd0] sm:$0xff]  ;;  %v620_v21 = vpack.c.bf16 %v367_v12, %v365_v11  ;;  %v376_v27 = vld [vmem:[#allocation11 + $0x158] sm:$0xff] }
  0x8f   :  { %v371_v24 = vld [vmem:[#allocation11 + $0x130] sm:$0xff]  ;;  %v374_v26 = vld [vmem:[#allocation11 + $0x148] sm:$0xff]  ;;  %v373_v33 = vld [vmem:[#allocation11 + $0x140] sm:$0xff] }
  0x90   :  { %240 = vmatmul.mubr.f32.vlgmr.msra.gmra.mrb[0].mxu0 %v142_v16  ;;  %609 = vmatpush1.bf16.msra.mxu1 %v608_v48  ;;  %v578_v16 = vpack.c.bf16 %v137_v8, %v135_v7  ;;  %v140_v30 = vld [vmem:[#allocation8 + $0xf0] sm:$0xff]  ;;  %v624_v31 = vpack.c.bf16 %v371_v24, %v369_v23  ;;  %v380_v37 = vld [vmem:[#allocation11 + $0x178] sm:$0xff]  ;;  %v377_v40 = vld [vmem:[#allocation11 + $0x160] sm:$0xff] }
  0x91   :  { %557 = vmatpush1.bf16.msra.mxu0 %v556_v17  ;;  %310 = vmatprep.mubr.f32.mxu0 %v863_v0  ;;  %v566_v0 = vpack.c.bf16 %v125_v36, %v123_v35  ;;  %v134_v17 = vld [vmem:[#allocation8 + $0xc0] sm:$0xff]  ;;  %v375_v34 = vld [vmem:[#allocation11 + $0x150] sm:$0xff]  ;;  %v378_v36 = vld [vmem:[#allocation11 + $0x168] sm:$0xff] }
  0x92   :  { %559 = vmatprep.subr.bf16.mxu0 %v558_v20  ;;  %611 = vmatprep.subr.bf16.mxu1 %v610_v49  ;;  %v141_v20 = vld [vmem:[#allocation8 + $0xf8] sm:$0xff]  ;;  %v580_v25 = vpack.c.bf16 %v136_v18, %v134_v17  ;;  %v628_v38 = vpack.c.bf16 %v375_v34, %v373_v33  ;;  %v630_v39 = vpack.c.bf16 %v380_v37, %v378_v36  ;;  %v109_v42 = vld [vmem:[#allocation2] sm:$0xff]  ;;  %v381_v46 = vld [vmem:[#allocation11 + $0x180] sm:$0xff] }
  0x93   :  { %v582_v28 = vpack.c.bf16 %v141_v20, %v139_v19  ;;  %v382_v43 = vld [vmem:[#allocation11 + $0x188] sm:$0xff]  ;;  %v383_v47 = vld [vmem:[#allocation11 + $0x190] sm:$0xff]  ;;  %v388_v49 = vld [vmem:[#allocation11 + $0x1b8] sm:$0xff] }
  0x94   :  { %613 = vmatpush1.bf16.msra.mxu1 %v612_v60  ;;  %v386_v48 = vld [vmem:[#allocation11 + $0x1a8] sm:$0xff]  ;;  %v636_v50 = vpack.c.bf16 %v383_v47, %v381_v46  ;;  %v387_v53 = vld [vmem:[#allocation11 + $0x1b0] sm:$0xff]  ;;  %v389_v58 = vld [vmem:[#allocation11 + $0x1c0] sm:$0xff] }
  0x95   :  { %561 = vmatpush1.bf16.msra.mxu0 %v560_v29  ;;  %615 = vmatprep.subr.bf16.mxu1 %v614_v61  ;;  %v138_v29 = vld [vmem:[#allocation8 + $0xe0] sm:$0xff]  ;;  %v638_v51 = vpack.c.bf16 %v388_v49, %v386_v48  ;;  %v390_v54 = vld [vmem:[#allocation11 + $0x1c8] sm:$0xff]  ;;  %v391_v59 = vld [vmem:[#allocation11 + $0x1d0] sm:$0xff] }
  0x96   :  { %563 = vmatprep.subr.bf16.mxu0 %v562_v32  ;;  %v626_v32 = vpack.c.bf16 %v376_v27, %v374_v26  ;;  %v584_v35 = vpack.c.bf16 %v140_v30, %v138_v29  ;;  %v644_v60 = vpack.c.bf16 %v391_v59, %v389_v58  ;;  %v394_v61 = vld [vmem:[#allocation11 + $0x1e8] sm:$0xff]  ;;  %v396_v62 = vld [vmem:[#allocation11 + $0x1f8] sm:$0xff]  ;;  %v395_v2 = vld [vmem:[#allocation11 + $0x1f0] sm:$0xff] }
  0x97   :  { %v646_v63 = vpack.c.bf16 %v396_v62, %v394_v61  ;;  %v317_v7 = vld [vmem:[%s1048_s5] sm:$0x3]  ;;  %s864_s5 = smov [#allocation13]  }
  0x98   :  { %617 = vmatpush1.bf16.msra.mxu1 %v616_v9  ;;  %v397_v17 = vld [vmem:[%s1050_s7] sm:$0x3]  ;;  %s496_s18 = sshll.u32 %s864_s5, 4  ;;  %s497_s18 = int_to_ptr.vmem [resolvable:$true] %s496_s18 }
  0x99   :  { %565 = vmatpush1.bf16.msra.mxu0 %v564_v41  ;;  %619 = vmatprep.subr.bf16.mxu1 %v618_v10  ;;  %v379_v41 = vld [vmem:[#allocation11 + $0x170] sm:$0xff]  ;;  %s799_s7 = scalar_lea.vmem %s497_s18, 128  ;;  %p804_p7 = scmp.lt.s32.totalorder %s497_s18, %s497_s18 }
  0x9a   :  { %567 = vmatprep.subr.bf16.mxu0 %v566_v0  ;;  %v384_v0 = vld [vmem:[#allocation11 + $0x198] sm:$0xff]  ;;  %v632_v44 = vpack.c.bf16 %v379_v41, %v377_v40  ;;  %p800_p6 = scmp.ne.s32.totalorder %s497_s18, %s799_s7  ;;  %p805_p8 = scmp.lt.s32.totalorder %s799_s7, %s799_s7 }
  0x9b   :  { %v634_v45 = vpack.c.bf16 %v384_v0, %v382_v43 }
  0x9c   :  { %621 = vmatpush1.bf16.msra.mxu1 %v620_v21  ;;  %p806_p9 = por %p805_p8, %p804_p7 }
  0x9d   :  { %569 = vmatpush1.bf16.msra.mxu0 %v568_v52  ;;  %623 = vmatprep.subr.bf16.mxu1 %v622_v22  ;;  %v385_v52 = vld [vmem:[#allocation11 + $0x1a0] sm:$0xff] }
  0x9e   :  { %571 = vmatprep.subr.bf16.mxu0 %v570_v55  ;;  %v392_v55 = vld [vmem:[#allocation11 + $0x1d8] sm:$0xff]  ;;  %v640_v56 = vpack.c.bf16 %v387_v53, %v385_v52  ;;  %p807_p10 = pnand %p806_p9, %p800_p6 }
  0x9f   :  { %v642_v57 = vpack.c.bf16 %v392_v55, %v390_v54 }
  0xa0   :  { %625 = vmatpush1.bf16.msra.mxu1 %v624_v31 }
  0xa1   :  { %573 = vmatpush1.bf16.msra.mxu0 %v572_v1  ;;  %627 = vmatprep.subr.bf16.mxu1 %v626_v32  ;;  %v393_v1 = vld [vmem:[#allocation11 + $0x1e0] sm:$0xff] }
  0xa2   :  { %575 = vmatprep.subr.bf16.mxu0 %v574_v4  ;;  %v648_v3 = vpack.c.bf16 %v395_v2, %v393_v1  ;;  %v319_v4 = vlaneseq }
  0xa4   :  { %629 = vmatpush1.bf16.msra.mxu1 %v628_v38  ;;  %v320_v5 = vshrl.u32 %v319_v4, 7 }
  0xa5   :  { %577 = vmatpush1.bf16.msra.mxu0 %v576_v13  ;;  %631 = vmatprep.subr.bf16.mxu1 %v630_v39 }
  0xa6   :  { %579 = vmatprep.subr.bf16.mxu0 %v578_v16  ;;  %v321_v6 = vsub.s32 0, %v320_v5  ;;  %v325_v8 = vsub.s32 1, %v320_v5 }
  0xa8   :  { %633 = vmatpush1.bf16.msra.mxu1 %v632_v44  ;;  %v322_v9 = vrot.slane %v317_v7, %v321_v6  ;;  %v326_v10 = vrot.slane %v317_v7, %v325_v8  ;;  %v402_v18 = vrot.slane %v397_v17, %v321_v6  ;;  %v406_v24 = vrot.slane %v397_v17, %v325_v8 }
  0xa9   :  { %581 = vmatpush1.bf16.msra.mxu0 %v580_v25  ;;  %635 = vmatprep.subr.bf16.mxu1 %v634_v45  ;;  %v481_v25 = vld [vmem:[#allocation7] sm:$0xff] }
  0xaa   :  { %583 = vmatprep.subr.bf16.mxu0 %v582_v28 }
  0xac   :  { %637 = vmatpush1.bf16.msra.mxu1 %v636_v50 }
  0xad   :  { %585 = vmatpush1.bf16.msra.mxu0 %v584_v35  ;;  %639 = vmatprep.subr.bf16.mxu1 %v638_v51 }
  0xb0   :  { %311 = vmatmul.mubr.f32.vlgmr.msra.gmra.mrb[0].mxu0 %v109_v42  ;;  %641 = vmatpush1.bf16.msra.mxu1 %v640_v56 }
  0xb1   :  { %643 = vmatprep.subr.bf16.mxu1 %v642_v57 }
  0xb4   :  { %645 = vmatpush1.bf16.msra.mxu1 %v644_v60 }
  0xb5   :  { %647 = vmatprep.subr.bf16.mxu1 %v646_v63 }
  0xb8   :  { %649 = vmatpush1.bf16.msra.mxu1 %v648_v3 }
 0x183   :  { %v312_v11 = vpop.f32.mrb[0].mxu0 }
 0x184   :  { %v329_v12 = vadd.f32 %v322_v9, %v312_v11  ;;  %v314_v13 = vpop.f32.mrb[1].mxu0 }
 0x185   :  { %v330_v14 = vadd.f32 %v326_v10, %v314_v13 }
 0x186   :  { %v331_v16 = vmax.f32 %v329_v12, 0.0 }
 0x187   :  { %v332_v15 = vmax.f32 %v330_v14, 0.0 }
 0x189   :  { %473 = vmatprep.mubr.f32.mxu1 %v332_v15 }
 0x18a   :  { %474 = vmatmul.mubr.f32.vlgmr.msra.gmra.mrb[0].mxu1 %v331_v16 }
 0x25d   :  { %v475_v19 = vpop.f32.mrb[0].mxu1 }
 0x25e   :  { %v476_v20 = vadd.f32 %v475_v19, %v402_v18  ;;  %v477_v21 = vpop.f32.mrb[1].mxu1 }
 0x25f   :  { %v478_v27 = vadd.f32 %v477_v21, %v406_v24 }
 0x260   :  { %663 = vtanh.f32 %v476_v20 }
 0x26a   :  { %v664_v22 = vpop.eup %663 }
 0x26b   :  { %v482_v23 = vmul.f32 1.442695, %v664_v22  ;;  %487 = vadd.xlane.f32.xlu0 %v664_v22 }
 0x26d   :  { %665 = vpow2.f32 %v482_v23 }
 0x277   :  { %v666_v26 = vpop.eup %665 }
 0x278   :  { %v484_v28 = vmul.f32 %v666_v26, %v481_v25 }
 0x27a   :  { %v485_v29 = vadd.f32 %v484_v28, %v478_v27 }
 0x27c   :  { %486 = vst [vmem:[#allocation13] sm:$0xff] %v485_v29 }
 0x27d   :  { %810 = shalt.err (!%p807_p10)
}
 0x27e   :  { %s811_s21 = scalar_lea.hbm %s1051_s8, 128 }
 0x27f   :  { %p812_p11 = scmp.ne.s32.totalorder %s1051_s8, %s811_s21  ;;  %p815_p12 = scmp.lt.u32.totalorder %s811_s21, %s1051_s8 }
 0x281   :  { %p817_p13 = pnand %p815_p12, %p812_p11 }
 0x283   :  { %820 = shalt.err (!%p817_p13)
}
 0x284   :  { %499 = dma.vmem_to_hbm [thread:$0]  %s497_s18, 128, %s1051_s8, [#allocation4]  }
 0x285   :  { %s865_s2 = smov [#allocation14]  }
 0x286   :  { %s506_s17 = sshll.u32 %s865_s2, 4  ;;  %s507_s17 = int_to_ptr.vmem [resolvable:$true] %s506_s17 }
 0x287   :  { %s821_s26 = scalar_lea.vmem %s507_s17, 128  ;;  %p826_p1 = scmp.lt.s32.totalorder %s507_s17, %s507_s17 }
 0x288   :  { %p822_p0 = scmp.ne.s32.totalorder %s507_s17, %s821_s26  ;;  %p827_p2 = scmp.lt.s32.totalorder %s821_s26, %s821_s26 }
 0x28a   :  { %p828_p3 = por %p827_p2, %p826_p1 }
 0x28c   :  { %p829_p4 = pnand %p828_p3, %p822_p0 }
 0x2f8   :  { %v488_v30 = vpop.xlane.xlu0 %487 }
 0x2f9   :  { %489 = vst [vmem:[#allocation14] sm:$0xff] %v488_v30 }
 0x2fa   :  { %832 = shalt.err (!%p829_p4)
}
 0x2fb   :  { %s833_s29 = scalar_lea.hbm %s1052_s9, 128 }
 0x2fc   :  { %p834_p5 = scmp.ne.s32.totalorder %s1052_s9, %s833_s29  ;;  %p837_p6 = scmp.lt.u32.totalorder %s833_s29, %s1052_s9 }
 0x2fe   :  { %p839_p7 = pnand %p837_p6, %p834_p5 }
 0x300   :  { %842 = shalt.err (!%p839_p7)
}
 0x301   :  { %509 = dma.vmem_to_hbm [thread:$0]  %s507_s17, 128, %s1052_s9, [#allocation15]  }
 0x302   :  { %851 = dma.done.wait [#allocation4], 128  }
 0x303   :  { %852 = vsyncadd [#allocation4], 4294967168 }
 0x304   :  { %853 = dma.done.wait [#allocation15], 128  }
 0x305   :  { %854 = vsyncadd [#allocation15], 4294967168 }
 0x306   :  { %516 = vsyncpa [#allocation3], 1 }
 0x307   :  { %517 = vsyncpa [#allocation6], 1 }
 0x308   :  { %518 = vsyncpa [#allocation9], 1 }
 0x309   :  { %519 = vsyncpa [#allocation12], 1 }
 0x30a   :  { %520 = vsyncpa [#allocation4], 1 }
 0x30b   :  { %521 = vsyncpa [#allocation15], 1 }

</bundles_post_ra>
